<compile_context>
chip_gen: v7x
topology: tpu7x:2x2x1
jax: 0.10.0
libtpu: 0.0.40
codegen_flags: <defaults>
</compile_context>

<pallas_src>
import jax
import jax.numpy as jnp
from jax import lax
from jax.experimental import pallas as pl
from jax.experimental.pallas import tpu as pltpu


def _rope_kernel_plain(pos_ref, inv_ref, cos_ref, sin_ref):
    # pos_ref: (tR, 1) int32   inv_ref: (1, dim) f32
    # cos_ref/sin_ref: (tR, dim) out dtype
    pos = pos_ref[...].astype(jnp.float32)        # (tR, 1)
    freqs = pos * inv_ref[...]                    # (tR, dim)  VPU broadcast-mul
    cos_ref[...] = jnp.cos(freqs).astype(cos_ref.dtype)
    sin_ref[...] = jnp.sin(freqs).astype(sin_ref.dtype)


def _rope_kernel_packed(pos_ref, sel_ref, inv_ref, cos_ref, sin_ref):
    # pos_ref: (tR, k) int32   sel_ref: (k, k*dim) f32 {0,1}   inv_ref: (1, k*dim) f32
    # cos_ref/sin_ref: (tR, k*dim) out dtype  (lane-dense, k*dim == 128)
    pos = pos_ref[...].astype(jnp.float32)        # (tR, k)
    # Exact "repeat each position dim times along lanes" via a 0/1 selection
    # matmul on the idle MXU (HIGHEST precision -> bit-exact f32 result).
    pos_dense = lax.dot_general(
        pos, sel_ref[...],
        dimension_numbers=(((1,), (0,)), ((), ())),
        precision=lax.Precision.HIGHEST,
        preferred_element_type=jnp.float32)       # (tR, k*dim)
    freqs = pos_dense * inv_ref[...]              # (tR, k*dim)
    cos_ref[...] = jnp.cos(freqs).astype(cos_ref.dtype)
    sin_ref[...] = jnp.sin(freqs).astype(sin_ref.dtype)


def llama_rotary_embedding(x, position_ids, *, dim, base=10000.0,
                           max_rows_per_tile=2048):
    """Returns (cos, sin) of shape (B, S, dim) in x.dtype."""
    B, S = position_ids.shape
    assert dim % 2 == 0, "rotary dim must be even"
    out_dtype = x.dtype

    # Lane-packing factor: fold k consecutive positions per 128-wide output row.
    if dim < 128 and 128 % dim == 0 and S % (128 // dim) == 0:
        k = 128 // dim
    else:
        k = 1
    R = (B * S) // k           # packed rows (batch+sequence flattened)
    width = k * dim            # output lane width (== 128 when packed)

    # Parameter setup (as in __init__), hoisted out of the kernel.
    inv_freq = 1.0 / (base ** (jnp.arange(0, dim, 2, dtype=jnp.float32) / dim))
    inv_full = jnp.concatenate([inv_freq, inv_freq])          # (dim,)
    inv_dense = jnp.tile(inv_full, k).reshape(1, width)       # (1, k*dim)

    # Positions fed sublane-major as int32; cast to f32 inside the kernel.
    pos = position_ids.astype(jnp.int32).reshape(R, k)

    # Rows per tile (sublane axis): full extent if small, else a multiple of 8.
    if R <= max_rows_per_tile:
        tR = R
    else:
        tR = max(8, (max_rows_per_tile // 8) * 8)
    num_r = pl.cdiv(R, tR)

    pos_spec = pl.BlockSpec((tR, k), lambda r: (r, 0))
    inv_spec = pl.BlockSpec((1, width), lambda r: (0, 0))
    out_spec = pl.BlockSpec((tR, width), lambda r: (r, 0))

    if k > 1:
        # 0/1 selection matrix: sel[i, j] = 1 iff j // dim == i.
        sel = (jnp.arange(k, dtype=jnp.int32)[:, None]
               == (jnp.arange(width, dtype=jnp.int32)[None, :] // dim)
               ).astype(jnp.float32)                           # (k, k*dim)
        kernel = _rope_kernel_packed
        in_specs = [pos_spec, pl.BlockSpec((k, width), lambda r: (0, 0)), inv_spec]
        args = (pos, sel, inv_dense)
    else:
        kernel = _rope_kernel_plain
        in_specs = [pos_spec, inv_spec]
        args = (pos, inv_dense)

    out_shape = (jax.ShapeDtypeStruct((R, width), out_dtype),
                 jax.ShapeDtypeStruct((R, width), out_dtype))

    grid_spec = pltpu.PrefetchScalarGridSpec(
        num_scalar_prefetch=0,
        grid=(num_r,),
        in_specs=in_specs,
        out_specs=[out_spec, out_spec],
    )

    cos, sin = pl.pallas_call(
        kernel,
        out_shape=out_shape,
        grid_spec=grid_spec,
        compiler_params=pltpu.CompilerParams(
            dimension_semantics=("parallel",),
            vmem_limit_bytes=32 * 1024 * 1024,
        ),
    )(*args)

    # Row-major metadata reshape back to the module's (B, S, dim) layout.
    return cos.reshape(B, S, dim), sin.reshape(B, S, dim)


def _reference(x, position_ids, *, dim, base=10000.0):
    inv_freq = 1.0 / (base ** (jnp.arange(0, dim, 2, dtype=jnp.float32) / dim))
    freqs = position_ids.astype(jnp.float32)[:, :, None] * inv_freq[None, None, :]
    emb = jnp.concatenate([freqs, freqs], axis=-1)
    return jnp.cos(emb).astype(x.dtype), jnp.sin(emb).astype(x.dtype)


if __name__ == "__main__":
    key = jax.random.PRNGKey(0)
    kx, kp, kx2 = jax.random.split(key, 3)

    # --- Test 1: dim < 128 -> lane-packed path (k = 4), f32 output ---
    B, S, H, dim = 2, 16, 4, 32
    x = jax.random.normal(kx, (B, H, S, dim), dtype=jnp.float32)
    position_ids = jax.random.randint(kp, (B, S), 0, 2048, dtype=jnp.int32)

    cos, sin = llama_rotary_embedding(x, position_ids, dim=dim)
    cos = jax.block_until_ready(cos)
    sin = jax.block_until_ready(sin)

    cos_ref, sin_ref = _reference(x, position_ids, dim=dim)
    assert cos.shape == (B, S, dim) and sin.shape == (B, S, dim)
    assert cos.dtype == x.dtype and sin.dtype == x.dtype
    assert jnp.allclose(cos, cos_ref, atol=1e-5), "cos mismatch (packed path)"
    assert jnp.allclose(sin, sin_ref, atol=1e-5), "sin mismatch (packed path)"

    # --- Test 2: dim == 128 -> plain lane-dense path, bf16 output cast ---
    B2, S2, dim2 = 2, 8, 128
    x2 = jax.random.normal(kx2, (B2, H, S2, dim2), dtype=jnp.bfloat16)
    pos2 = jnp.broadcast_to(jnp.arange(S2, dtype=jnp.int32)[None, :], (B2, S2))

    cos2, sin2 = llama_rotary_embedding(x2, pos2, dim=dim2)
    cos2 = jax.block_until_ready(cos2)
    sin2 = jax.block_until_ready(sin2)

    cos2_ref, sin2_ref = _reference(x2, pos2, dim=dim2)
    assert cos2.shape == (B2, S2, dim2) and cos2.dtype == jnp.bfloat16
    assert jnp.allclose(cos2.astype(jnp.float32), cos2_ref.astype(jnp.float32), atol=1e-2)
    assert jnp.allclose(sin2.astype(jnp.float32), sin2_ref.astype(jnp.float32), atol=1e-2)

    print("KERNEL_OK")
</pallas_src>

<mosaic_0001>
module attributes {stable_mosaic.version = 11 : i64} {
  func.func @_rope_kernel_packed(%arg0: i32, %arg1: memref<8x4xi32, #tpu.memory_space<vmem>>, %arg2: memref<4x128xf32, #tpu.memory_space<vmem>>, %arg3: memref<1x128xf32, #tpu.memory_space<vmem>>, %arg4: memref<8x128xf32, #tpu.memory_space<vmem>>, %arg5: memref<8x128xf32, #tpu.memory_space<vmem>>) attributes {dimension_semantics = [#tpu.dimension_semantics<parallel>], iteration_bounds = array<i64: 1>, scalar_prefetch = 0 : i64, scratch_operands = 0 : i64, tpu.core_type = #tpu.core_type<tc>, window_params = [{transform_indices = @transform_0, window_bounds = array<i64: 8, 4>}, {pipeline_mode = #tpu.pipeline_mode<synchronous>, transform_indices = @transform_1, window_bounds = array<i64: 4, 128>}, {pipeline_mode = #tpu.pipeline_mode<synchronous>, transform_indices = @transform_2, window_bounds = array<i64: 1, 128>}, {transform_indices = @transform_3, window_bounds = array<i64: 8, 128>}, {transform_indices = @transform_4, window_bounds = array<i64: 8, 128>}]} {
    %c0 = arith.constant 0 : index
    %c0_0 = arith.constant 0 : index
    %0 = vector.load %arg1[%c0, %c0_0] : memref<8x4xi32, #tpu.memory_space<vmem>>, vector<8x4xi32>
    %1 = arith.sitofp %0 : vector<8x4xi32> to vector<8x4xf32>
    %c0_1 = arith.constant 0 : index
    %c0_2 = arith.constant 0 : index
    %2 = vector.load %arg2[%c0_1, %c0_2] : memref<4x128xf32, #tpu.memory_space<vmem>>, vector<4x128xf32>
    %cst = arith.constant dense<0.000000e+00> : vector<8x128xf32>
    %3 = tpu.matmul %1, %2, %cst {dimension_numbers = #tpu.dot_dimension_numbers<[1], [0], [0], [1], [0, 0, 1, 1], [], []>, precision = #tpu.contract_precision<fp32>} : vector<8x4xf32>, vector<4x128xf32>, vector<8x128xf32> -> vector<8x128xf32>
    %c0_3 = arith.constant 0 : index
    %c0_4 = arith.constant 0 : index
    %4 = vector.load %arg3[%c0_3, %c0_4] : memref<1x128xf32, #tpu.memory_space<vmem>>, vector<1x128xf32>
    %5 = vector.broadcast %4 : vector<1x128xf32> to vector<8x128xf32>
    %6 = arith.mulf %3, %5 : vector<8x128xf32>
    %7 = math.cos %6 : vector<8x128xf32>
    %c0_5 = arith.constant 0 : index
    %c0_6 = arith.constant 0 : index
    %8 = vector.load %arg4[%c0_5, %c0_6] : memref<8x128xf32, #tpu.memory_space<vmem>>, vector<8x128xf32>
    tpu.vector_store %arg4[%c0_5, %c0_6], %7 {strides = array<i32>} : memref<8x128xf32, #tpu.memory_space<vmem>>, vector<8x128xf32>,
    %9 = math.sin %6 : vector<8x128xf32>
    %c0_7 = arith.constant 0 : index
    %c0_8 = arith.constant 0 : index
    %10 = vector.load %arg5[%c0_7, %c0_8] : memref<8x128xf32, #tpu.memory_space<vmem>>, vector<8x128xf32>
    tpu.vector_store %arg5[%c0_7, %c0_8], %9 {strides = array<i32>} : memref<8x128xf32, #tpu.memory_space<vmem>>, vector<8x128xf32>,
    return
  }
  func.func @transform_0(%arg0: i32) -> (i32, i32) {
    %c0_i32 = arith.constant 0 : i32
    %c0_i32_0 = arith.constant 0 : i32
    return %arg0, %c0_i32 : i32, i32
  }
  func.func @transform_1(%arg0: i32) -> (i32, i32) {
    %c0_i32 = arith.constant 0 : i32
    %c0_i32_0 = arith.constant 0 : i32
    %c0_i32_1 = arith.constant 0 : i32
    return %c0_i32, %c0_i32_0 : i32, i32
  }
  func.func @transform_2(%arg0: i32) -> (i32, i32) {
    %c0_i32 = arith.constant 0 : i32
    %c0_i32_0 = arith.constant 0 : i32
    %c0_i32_1 = arith.constant 0 : i32
    return %c0_i32, %c0_i32_0 : i32, i32
  }
  func.func @transform_3(%arg0: i32) -> (i32, i32) {
    %c0_i32 = arith.constant 0 : i32
    %c0_i32_0 = arith.constant 0 : i32
    return %arg0, %c0_i32 : i32, i32
  }
  func.func @transform_4(%arg0: i32) -> (i32, i32) {
    %c0_i32 = arith.constant 0 : i32
    %c0_i32_0 = arith.constant 0 : i32
    return %arg0, %c0_i32 : i32, i32
  }
}

</mosaic_0001>

<bundles_post_ra>
// kernel: tpu_custom_call.1
= control target key start
LH: loop header
LB: loop body
LE: loop exit
PB: predicated region body
PF: predicated region fallthrough
CT: control target
= control target key end

     0   :  { %10 = vsyncpa [#allocation3], 0  ;;  %vm25_vm0 = vcmask 1043456   ;;  %v846_v2 = vmov 0.0   ;;  %vm847_vm1 = vmmov 0   ;;  %vm21_vm2 = vcmask 31744   ;;  %s941_s0 = inlined_call_operand.vmem [shape: s32[8,4], index: 0, kind: input, shape index: {}]   ;;  %s942_s1 = inlined_call_operand.vmem [shape: f32[4,128], index: 1, kind: input, shape index: {}]   ;;  %s943_s2 = inlined_call_operand.vmem [shape: f32[1,128], index: 2, kind: input, shape index: {}]   ;;  %s944_s3 = inlined_call_operand.hbm [shape: f32[8,128], index: 3, kind: output, shape index: {0}]   ;;  %s945_s4 = inlined_call_operand.hbm [shape: f32[8,128], index: 4, kind: output, shape index: {1}]  }
   0x1   :  { %v20_v0 = vld [vmem:[%s942_s1] sm:$0xf]  ;;  %756 = vmatprep.subr.mxu0 %v846_v2  ;;  %758 = vmatprep.mubr.msk.f32.mxu0 %vm847_vm1, %v846_v2 }
   0x2   :  { %v18_v1 = vld [vmem:[%s941_s0] sm:$0xff]  ;;  %v27_v3 = vsel %vm25_vm0, %v20_v0, 0 }
   0x3   :  { %v19_v4 = vcvt.s32.f32 %v18_v1 }
   0x4   :  { %11 = vsyncpa [#allocation5], 0  ;;  %v30_v5 = vand.u32 4294901760, %v27_v3  ;;  %741 = vmatprep.subr.mxu1 %v846_v2  ;;  %743 = vmatprep.mubr.msk.f32.mxu1 %vm847_vm1, %v846_v2  ;;  %v720_v19 = vld [vmem:[%s943_s2] ss:$0 sm:$0xff]  ;;  %s854_s2 = smov [#allocation2]  }
   0x5   :  { %v23_v6 = vsel %vm21_vm2, %v19_v4, 0  ;;  %v848_v33 = vmov 683565275   ;;  %v849_v35 = vmov 2475754826   ;;  %s698_s19 = sshll.u32 %s854_s2, 4  ;;  %s699_s19 = int_to_ptr.vmem [resolvable:$true] %s698_s19 }
   0x6   :  { %v107_v7 = vsub.f32 %v27_v3, %v30_v5  ;;  %757 = vmatpush3.msra.mxu0 %v30_v5  ;;  %v95_v8 = vand.u32 4294901760, %v23_v6  ;;  %742 = vmatpush3.msra.mxu1 %v30_v5  ;;  %v850_v38 = vmov 2131351028   ;;  %v851_v41 = vmov 2102212464   ;;  %s855_s20 = smov [#allocation4]   ;;  %p803_p1 = scmp.lt.s32.totalorder %s699_s19, %s699_s19 }
   0x7   :  { %746 = vmatprep.subr.mxu1 %v846_v2  ;;  %761 = vmatprep.subr.mxu0 %v846_v2  ;;  %v852_v44 = vmov 920167782   ;;  %v853_v47 = vmov 1326507024   ;;  %s708_s21 = sshll.u32 %s855_s20, 4  ;;  %s798_s22 = scalar_lea.vmem %s699_s19, 128  ;;  %s709_s21 = int_to_ptr.vmem [resolvable:$true] %s708_s21 }
   0x8   :  { %v96_v9 = vsub.f32 %v23_v6, %v95_v8  ;;  %v108_v10 = vand.u32 4294901760, %v107_v7  ;;  %p799_p0 = scmp.ne.s32.totalorder %s699_s19, %s798_s22  ;;  %p804_p2 = scmp.lt.s32.totalorder %s798_s22, %s798_s22 }
   0xa   :  { %v97_v11 = vand.u32 4294901760, %v96_v9  ;;  %v109_v12 = vsub.f32 %v107_v7, %v108_v10  ;;  %p805_p3 = por %p804_p2, %p803_p1 }
   0xc   :  { %759 = vmatmul.mubr.f32.vlgmr.msra.gmra.mrb[0].mxu0 %v97_v11  ;;  %v98_v13 = vsub.f32 %v96_v9, %v97_v11  ;;  %v110_v14 = vand.u32 4294901760, %v109_v12  ;;  %p806_p4 = pnand %p805_p3, %p799_p0 }
   0xd   :  { %762 = vmatpush3.msra.mxu0 %v108_v10  ;;  %763 = vmatprep.mubr.msk.f32.mxu0 %vm847_vm1, %v846_v2 }
   0xe   :  { %v99_v15 = vand.u32 4294901760, %v98_v13  ;;  %766 = vmatprep.subr.mxu0 %v846_v2 }
  0x10   :  { %744 = vmatmul.mubr.f32.vlgmr.msra.gmra.mrb[0].mxu1 %v99_v15 }
  0x11   :  { %747 = vmatpush3.msra.mxu1 %v110_v14  ;;  %748 = vmatprep.mubr.msk.f32.mxu1 %vm847_vm1, %v846_v2 }
  0x12   :  { %751 = vmatprep.subr.mxu1 %v846_v2 }
  0x14   :  { %764 = vmatmul.mubr.f32.vlgmr.msra.gmra.mrb[0].mxu0 %v95_v8 }
  0x15   :  { %767 = vmatpush3.msra.mxu0 %v30_v5  ;;  %768 = vmatprep.mubr.msk.f32.mxu0 %vm847_vm1, %v846_v2 }
  0x18   :  { %749 = vmatmul.mubr.f32.vlgmr.msra.gmra.mrb[0].mxu1 %v95_v8 }
  0x19   :  { %752 = vmatpush3.msra.mxu1 %v107_v7  ;;  %753 = vmatprep.mubr.msk.f32.mxu1 %vm847_vm1, %v846_v2 }
  0x1c   :  { %769 = vmatmul.mubr.f32.vlgmr.msra.gmra.mrb[0].mxu0 %v95_v8 }
  0x20   :  { %754 = vmatmul.mubr.f32.vlgmr.msra.gmra.mrb[0].mxu1 %v96_v9 }
  0xef   :  { %v471_v16 = vpop.f32.mrb[0].mxu0 }
  0xf0   :  { %v770_v17 = vpop.f32.mrb[1].mxu0 }
  0xf3   :  { %v251_v18 = vpop.f32.mrb[0].mxu1 }
  0xf4   :  { %v771_v20 = vadd.f32 %v471_v16, %v251_v18  ;;  %v755_v21 = vpop.f32.mrb[1].mxu1 }
  0xf6   :  { %v896_v22 = vmul.f32 %v771_v20, %v720_v19 }
  0xf8   :  { %v486_v23 = vand.u32 2139095040, %v896_v22  ;;  %v483_v27 = vand.u32 2147483647, %v896_v22  ;;  %vm485_vm10 = vcmp.lt.s32.totalorder %v896_v22, 0  ;;  %vm575_vm2 = vweird.f32 %v896_v22 }
  0xfa   :  { %v487_v24 = vshrl.u32 %v486_v23, 23  ;;  %v490_v31 = vand.u32 8388607, %v483_v27  ;;  %vm484_vm11 = vcmp.le.f32.partialorder %v483_v27, 0.7853982 }
  0xfc   :  { %v721_v25 = vadd.s32 4294967169, %v487_v24  ;;  %v491_v49 = vor.u32 8388608, %v490_v31 }
  0xfe   :  { %v493_v26 = vadd.s32 1, %v721_v25  ;;  %v531_v63 = vshll.u32 %v491_v49, 8 }
 0x100   :  { %vm494_vm3 = vcmp.gt.s32.totalorder %v493_v26, 0 }
 0x101   :  { %v495_v28 = vsel %vm494_vm3, %v493_v26, 0 }
 0x102   :  { %v497_v29 = vand.u32 31, %v495_v28  ;;  %v496_v32 = vshrl.u32 %v495_v28, 5 }
 0x104   :  { %v498_v30 = vsub.s32 32, %v497_v29  ;;  %v500_v34 = vshll.u32 %v848_v33, %v497_v29  ;;  %v503_v36 = vshll.u32 %v849_v35, %v497_v29  ;;  %v506_v40 = vshll.u32 %v850_v38, %v497_v29 }
 0x105   :  { %v509_v43 = vshll.u32 %v851_v41, %v497_v29  ;;  %v512_v46 = vshll.u32 %v852_v44, %v497_v29  ;;  %vm515_vm4 = vcmp.lt.s32.totalorder %v496_v32, 1  ;;  %vm518_vm5 = vcmp.lt.s32.totalorder %v496_v32, 4 }
 0x106   :  { %v501_v37 = vshrl.u32 %v849_v35, %v498_v30  ;;  %v504_v39 = vshrl.u32 %v850_v38, %v498_v30  ;;  %v507_v42 = vshrl.u32 %v851_v41, %v498_v30  ;;  %v510_v45 = vshrl.u32 %v852_v44, %v498_v30 }
 0x107   :  { %v513_v48 = vshrl.u32 %v853_v47, %v498_v30  ;;  %v499_v58 = vshrl.u32 %v848_v33, %v498_v30  ;;  %vm517_vm6 = vcmp.lt.s32.totalorder %v496_v32, 3  ;;  %vm516_vm7 = vcmp.lt.s32.totalorder %v496_v32, 2 }
 0x108   :  { %v502_v50 = vor.u32 %v501_v37, %v500_v34  ;;  %v505_v51 = vor.u32 %v504_v39, %v503_v36  ;;  %v508_v52 = vor.u32 %v507_v42, %v506_v40  ;;  %v511_v53 = vor.u32 %v510_v45, %v509_v43 }
 0x109   :  { %v514_v54 = vor.u32 %v513_v48, %v512_v46 }
 0x10a   :  { %v520_v55 = vsel %vm518_vm5, %v508_v52, 2102212464  ;;  %v523_v56 = vsel %vm515_vm4, %v502_v50, %v505_v51  ;;  %v527_v57 = vsel %vm515_vm4, %v505_v51, %v508_v52  ;;  %v524_v59 = vsel %vm518_vm5, %v511_v53, 920167782 }
 0x10b   :  { %v528_v60 = vsel %vm518_vm5, %v514_v54, 1326507024  ;;  %v525_v61 = vsel %vm517_vm6, %v508_v52, %v524_v59  ;;  %v519_v0 = vsel %vm515_vm4, %v499_v58, %v502_v50  ;;  %v521_v1 = vsel %vm517_vm6, %v505_v51, %v520_v55 }
 0x10c   :  { %v529_v62 = vsel %vm517_vm6, %v511_v53, %v528_v60  ;;  %v526_v2 = vsel %vm516_vm7, %v523_v56, %v525_v61  ;;  %v522_v8 = vsel %vm516_vm7, %v519_v0, %v521_v1 }
 0x10d   :  { %v530_v3 = vsel %vm516_vm7, %v527_v57, %v529_v62  ;;  %v905_v6 = vmul.u32.u64.low %v531_v63, %v526_v2  ;;  %v906_v7 = vmul.u32.u64.high %v531_v63, %v526_v2, %v905_v6  ;;  %v538_v10 = vmul.u32 %v531_v63, %v522_v8 }
 0x10e   :  { %v902_v4 = vmul.u32.u64.low %v531_v63, %v530_v3  ;;  %v903_v5 = vmul.u32.u64.high %v531_v63, %v530_v3, %v902_v4 }
 0x10f   :  { %v541_v9 = vadd.s32 1, %v906_v7 }
 0x110   :  { %vm540_vm8 = vc.u32 %v903_v5, %v905_v6  ;;  %v539_v23 = vadd.s32 %v905_v6, %v903_v5 }
 0x111   :  { %v542_v11 = vsel %vm540_vm8, %v541_v9, %v906_v7 }
 0x112   :  { %v543_v12 = vadd.s32 %v542_v11, %v538_v10 }
 0x114   :  { %v544_v13 = vadd.s32 536870912, %v543_v12 }
 0x116   :  { %v545_v14 = vshrl.u32 %v544_v13, 30 }
 0x118   :  { %v546_v15 = vshll.u32 %v545_v14, 30  ;;  %v569_v36 = vsub.s32 4, %v545_v14 }
 0x11a   :  { %v547_v16 = vsub.s32 %v543_v12, %v546_v15  ;;  %v570_v39 = vsel %vm485_vm10, %v569_v36, %v545_v14 }
 0x11b   :  { %v572_v41 = vsel %vm484_vm11, 0, %v570_v39 }
 0x11c   :  { %v549_v17 = vsub.s32 0, %v547_v16  ;;  %v680_v42 = vadd.s32 3, %v572_v41  ;;  %v576_v43 = vand.u32 3, %v572_v41 }
 0x11e   :  { %v722_v18 = vmin.u32 %v549_v17, %v547_v16  ;;  %v681_v44 = vand.u32 3, %v680_v42  ;;  %vm581_vm12 = vcmp.eq.s32.totalorder %v576_v43, 2  ;;  %vm578_vm14 = vcmp.eq.s32.totalorder %v576_v43, 0 }
 0x11f   :  { %vm577_vm0 = vcmp.lt.s32.totalorder %v576_v43, 2 }
 0x120   :  { %v551_v19 = vclz %v722_v18  ;;  %vm686_vm13 = vcmp.eq.s32.totalorder %v681_v44, 2  ;;  %vm683_vm15 = vcmp.eq.s32.totalorder %v681_v44, 0  ;;  %vm682_vm1 = vcmp.lt.s32.totalorder %v681_v44, 2 }
 0x122   :  { %v723_v20 = vadd.s32 4294967294, %v551_v19 }
 0x124   :  { %vm724_vm9 = vcmp.lt.s32.totalorder %v723_v20, 0 }
 0x125   :  { %v554_v21 = vsel %vm724_vm9, 0, %v723_v20 }
 0x126   :  { %v555_v24 = vsub.s32 32, %v554_v21  ;;  %v559_v25 = vsub.s32 4294967266, %v554_v21  ;;  %v556_v26 = vshll.u32 %v547_v16, %v554_v21 }
 0x128   :  { %v557_v28 = vshrl.u32 %v539_v23, %v555_v24  ;;  %v560_v29 = vadd.s32 127, %v559_v25 }
 0x12a   :  { %v558_v30 = vor.u32 %v557_v28, %v556_v26  ;;  %v561_v31 = vshll.u32 %v560_v29, 23 }
 0x12c   :  { %v562_v32 = vor.u32 4788187, %v561_v31  ;;  %v565_v34 = vcvt.s32.f32 %v558_v30 }
 0x12e   :  { %v563_v33 = vand.u32 2147483647, %v562_v32 }
 0x130   :  { %v566_v35 = vmul.f32 %v565_v34, %v563_v33 }
 0x132   :  { %v567_v37 = vxor.u32 2147483648, %v566_v35 }
 0x134   :  { %v568_v38 = vsel %vm485_vm10, %v567_v37, %v566_v35 }
 0x135   :  { %v571_v40 = vsel %vm484_vm11, %v896_v22, %v568_v38 }
 0x136   :  { %794 = vcosq.f32 %v571_v40 }
 0x137   :  { %796 = vsinq.f32 %v571_v40 }
 0x140   :  { %v795_v45 = vpop.eup %794 }
 0x141   :  { %v797_v46 = vpop.eup %796  ;;  %v582_v47 = vxor.u32 2147483648, %v795_v45 }
 0x142   :  { %v579_v48 = vxor.u32 2147483648, %v797_v46 }
 0x143   :  { %v583_v27 = vsel %vm581_vm12, %v582_v47, %v797_v46  ;;  %v688_v49 = vsel %vm686_vm13, %v582_v47, %v797_v46 }
 0x144   :  { %v580_v50 = vsel %vm578_vm14, %v795_v45, %v579_v48  ;;  %v685_v51 = vsel %vm683_vm15, %v795_v45, %v579_v48 }
 0x145   :  { %v584_v52 = vsel %vm577_vm0, %v580_v50, %v583_v27  ;;  %v689_v53 = vsel %vm682_vm1, %v685_v51, %v688_v49 }
 0x146   :  { %v585_v54 = vsel %vm575_vm2, nan, %v584_v52  ;;  %v690_v55 = vsel %vm575_vm2, nan, %v689_v53 }
 0x147   :  { %586 = vst [vmem:[#allocation2] sm:$0xff] %v585_v54  ;;  %691 = vst [vmem:[#allocation4] sm:$0xff] %v690_v55 }
 0x148   :  { %809 = shalt.err (!%p806_p4)
}
 0x149   :  { %s810_s25 = scalar_lea.hbm %s944_s3, 128 }
 0x14a   :  { %p811_p5 = scmp.ne.s32.totalorder %s944_s3, %s810_s25  ;;  %p814_p6 = scmp.lt.u32.totalorder %s810_s25, %s944_s3 }
 0x14c   :  { %p816_p7 = pnand %p814_p6, %p811_p5 }
 0x14e   :  { %819 = shalt.err (!%p816_p7)
}
 0x14f   :  { %701 = dma.vmem_to_hbm [thread:$0]  %s699_s19, 128, %s944_s3, [#allocation3]  }
 0x150   :  { %s820_s6 = scalar_lea.vmem %s709_s21, 128  ;;  %p825_p9 = scmp.lt.s32.totalorder %s709_s21, %s709_s21 }
 0x151   :  { %p821_p8 = scmp.ne.s32.totalorder %s709_s21, %s820_s6  ;;  %p826_p10 = scmp.lt.s32.totalorder %s820_s6, %s820_s6 }
 0x153   :  { %p827_p11 = por %p826_p10, %p825_p9 }
 0x155   :  { %p828_p12 = pnand %p827_p11, %p821_p8 }
 0x157   :  { %831 = shalt.err (!%p828_p12)
}
 0x158   :  { %s832_s9 = scalar_lea.hbm %s945_s4, 128 }
 0x159   :  { %p833_p13 = scmp.ne.s32.totalorder %s945_s4, %s832_s9  ;;  %p836_p0 = scmp.lt.u32.totalorder %s832_s9, %s945_s4 }
 0x15b   :  { %p838_p1 = pnand %p836_p0, %p833_p13 }
 0x15d   :  { %841 = shalt.err (!%p838_p1)
}
 0x15e   :  { %711 = dma.vmem_to_hbm [thread:$0]  %s709_s21, 128, %s945_s4, [#allocation5]  }
 0x15f   :  { %842 = dma.done.wait [#allocation3], 128  }
 0x160   :  { %843 = vsyncadd [#allocation3], 4294967168 }
 0x161   :  { %844 = dma.done.wait [#allocation5], 128  }
 0x162   :  { %845 = vsyncadd [#allocation5], 4294967168 }
 0x163   :  { %718 = vsyncpa [#allocation3], 1 }
 0x164   :  { %719 = vsyncpa [#allocation5], 1 }

</bundles_post_ra>
